<compile_context>
chip_gen: v6e
topology: v6e:2x2x1
jax: 0.10.0
libtpu: 0.0.40
codegen_flags: <defaults>
</compile_context>

<pallas_src>
import functools

import numpy as np

import jax
import jax.numpy as jnp
from jax.experimental import pallas as pl
from jax.experimental.pallas import tpu as pltpu


def _bilinear_interp_matrix_np(n_in: int) -> np.ndarray:
    """(2*n_in, n_in) matrix reproducing torch Upsample(scale_factor=2,
    mode='bilinear', align_corners=False) along one axis.  Host numpy."""
    n_out = 2 * n_in
    i = np.arange(n_out, dtype=np.float64)
    # PyTorch half-pixel source index, clamped at 0 for align_corners=False.
    src = np.maximum((i + 0.5) / 2.0 - 0.5, 0.0)
    i0 = np.floor(src).astype(np.int64)
    i1 = np.minimum(i0 + 1, n_in - 1)
    w1 = src - i0
    w0 = 1.0 - w1
    m = np.zeros((n_out, n_in), dtype=np.float64)
    rows = np.arange(n_out)
    np.add.at(m, (rows, i0), w0)
    np.add.at(m, (rows, i1), w1)   # i0 == i1 at the clamped edge -> weight 1
    return m


@functools.lru_cache(maxsize=None)
def _combined_upsample_operator(h: int, w: int, dtype_str: str) -> jax.Array:
    """Host-built, cached combined operator A of shape (H*W, 4*H*W):
    up_flat[.., u*2W + v] = sum_{y,x} x_flat[.., y*W + x] * Ah[u, y] * Aw[v, x].
    Pre-transposed so the kernel does a single lane-dense right-matmul."""
    ah = _bilinear_interp_matrix_np(h)       # (2H, H)
    aw = _bilinear_interp_matrix_np(w)       # (2W, W)
    a = np.kron(ah, aw).T                    # (H*W, 4*H*W)
    return jnp.asarray(a.astype(dtype_str))


def _num_parallel_blocks(n: int) -> int:
    """Batch-grid length: 1 on single-TC chips (v5e/v6e), 2 on dual-TC v7x."""
    try:
        kind = jax.devices()[0].device_kind.lower()
    except Exception:
        kind = ""
    dual_tc = ("v7" in kind) or ("7x" in kind)
    blocks = min(n, 2) if dual_tc else 1
    return blocks if (blocks > 0 and n % blocks == 0) else 1


def _upsample_conv_kernel(x_ref, w_ref, a_ref, o_ref):
    # x_ref: (NB*Cin, H*W)      -- NB batches stacked along sublanes
    # w_ref: (NB*Cout, NB*Cin)  -- block-diagonal kron(I_NB, W_conv)
    # a_ref: (H*W, 4*H*W)       -- combined bilinear-x2 operator
    # o_ref: (NB*Cout, 4*H*W)   -- lane-dense output slab
    # 1x1 conv (channel mix) first: exact commute with the linear upsampling,
    # and it keeps the big matmul at Cout (not Cin) rows.
    y = jnp.dot(w_ref[...], x_ref[...], preferred_element_type=jnp.float32)
    up = jnp.dot(y, a_ref[...], preferred_element_type=jnp.float32)
    o_ref[...] = up.astype(o_ref.dtype)


def upsample_forward(x, conv_w):
    """x: (N, Cin, H, W); conv_w: (Cout, Cin) or (Cout, Cin, 1, 1).
    Returns (N, Cout, 2H, 2W) == UpSample.forward(x)."""
    if conv_w.ndim == 4:                      # nn.Conv2d weight (Cout,Cin,1,1)
        conv_w = conv_w.reshape(conv_w.shape[0], conv_w.shape[1])
    n, cin, h, w_dim = x.shape
    cout = conv_w.shape[0]
    hw = h * w_dim
    hw4 = 4 * hw

    # Host-built, cached constant operator (float32 bilinear weights).
    a = _combined_upsample_operator(h, w_dim, "float32")

    nblk = _num_parallel_blocks(n)
    nb = n // nblk                            # batches folded per grid step

    # (N, Cin, H, W) -> (nblk, NB*Cin, HW): pure reshape, no transpose.
    x_flat = x.reshape(nblk, nb * cin, hw)
    # Block-diagonal weight folds NB batches into the MXU M dimension (tiny).
    w_block = jnp.kron(jnp.eye(nb, dtype=conv_w.dtype), conv_w)  # (NB*Cout, NB*Cin)

    out_flat = pl.pallas_call(
        _upsample_conv_kernel,
        out_shape=jax.ShapeDtypeStruct((nblk, nb * cout, hw4), x.dtype),
        grid_spec=pltpu.PrefetchScalarGridSpec(
            num_scalar_prefetch=0,
            grid=(nblk,),
            in_specs=[
                pl.BlockSpec((pl.Squeezed(), nb * cin, hw),
                             lambda b: (b, 0, 0)),
                # Grid-invariant operands: constant index_map -> single buffer
                # (double-buffering A only burns VMEM as spatial size grows).
                pl.BlockSpec((nb * cout, nb * cin), lambda b: (0, 0),
                             pipeline_mode=pl.Buffered(1)),
                pl.BlockSpec((hw, hw4), lambda b: (0, 0),
                             pipeline_mode=pl.Buffered(1)),
            ],
            out_specs=pl.BlockSpec((pl.Squeezed(), nb * cout, hw4),
                                   lambda b: (b, 0, 0)),
        ),
        compiler_params=pltpu.CompilerParams(
            dimension_semantics=("parallel",)),
    )(x_flat, w_block, a)

    # (nblk, NB*Cout, 4HW) -> (N, Cout, 2H, 2W): pure reshape (batch-major).
    return out_flat.reshape(n, cout, 2 * h, 2 * w_dim)


def _reference(x, conv_w):
    """Pure-JAX reference in the PyTorch order: bilinear x2 then 1x1 conv."""
    _, _, h, w_dim = x.shape
    ah = jnp.asarray(_bilinear_interp_matrix_np(h), dtype=jnp.float32)
    aw = jnp.asarray(_bilinear_interp_matrix_np(w_dim), dtype=jnp.float32)
    up = jnp.einsum('uh,nchw,vw->ncuv', ah, x, aw)
    return jnp.einsum('oc,ncuv->nouv', conv_w, up)


if __name__ == "__main__":
    in_channels, s_factor = 4, 2
    cin = in_channels + s_factor          # conv input channels  (6)
    cout = in_channels                    # conv output channels (4)
    N, H, W = 2, 16, 16

    key = jax.random.PRNGKey(0)
    kx, kw = jax.random.split(key)
    x = jax.random.normal(kx, (N, cin, H, W), dtype=jnp.float32)
    # Weight for nn.Conv2d(cin, cout, 1, bias=False); trivial 1x1 spatial
    # dims dropped -> stored as (Cout, Cin).
    conv_w = 0.1 * jax.random.normal(kw, (cout, cin), dtype=jnp.float32)

    out = upsample_forward(x, conv_w)
    out = jax.block_until_ready(out)

    assert out.shape == (N, cout, 2 * H, 2 * W)
    ref = _reference(x, conv_w)
    assert jnp.allclose(out, ref, atol=1e-4, rtol=1e-4)

    print("KERNEL_OK")
</pallas_src>

<mosaic_0001>
module attributes {stable_mosaic.version = 11 : i64} {
  func.func @_upsample_conv_kernel(%arg0: i32, %arg1: memref<1x12x256xf32, #tpu.memory_space<vmem>>, %arg2: memref<8x12xf32, #tpu.memory_space<vmem>>, %arg3: memref<256x1024xf32, #tpu.memory_space<vmem>>, %arg4: memref<1x8x1024xf32, #tpu.memory_space<vmem>>) attributes {dimension_semantics = [#tpu.dimension_semantics<parallel>], iteration_bounds = array<i64: 1>, scalar_prefetch = 0 : i64, scratch_operands = 0 : i64, tpu.core_type = #tpu.core_type<tc>, window_params = [{transform_indices = @transform_0, window_bounds = array<i64: 1, 12, 256>}, {pipeline_mode = #tpu.pipeline_mode<synchronous>, transform_indices = @transform_1, window_bounds = array<i64: 8, 12>}, {pipeline_mode = #tpu.pipeline_mode<synchronous>, transform_indices = @transform_2, window_bounds = array<i64: 256, 1024>}, {transform_indices = @transform_3, window_bounds = array<i64: 1, 8, 1024>}]} {
    %c0 = arith.constant 0 : index
    %c0_0 = arith.constant 0 : index
    %0 = vector.load %arg2[%c0, %c0_0] : memref<8x12xf32, #tpu.memory_space<vmem>>, vector<8x12xf32>
    %c0_1 = arith.constant 0 : index
    %c0_2 = arith.constant 0 : index
    %c0_3 = arith.constant 0 : index
    %1 = vector.load %arg1[%c0_1, %c0_2, %c0_3] : memref<1x12x256xf32, #tpu.memory_space<vmem>>, vector<1x12x256xf32>
    %2 = vector.shape_cast %1 : vector<1x12x256xf32> to vector<12x256xf32>
    %cst = arith.constant dense<0.000000e+00> : vector<8x256xf32>
    %3 = tpu.matmul %0, %2, %cst {dimension_numbers = #tpu.dot_dimension_numbers<[1], [0], [0], [1], [0, 0, 1, 1], [], []>} : vector<8x12xf32>, vector<12x256xf32>, vector<8x256xf32> -> vector<8x256xf32>
    %c0_4 = arith.constant 0 : index
    %c0_5 = arith.constant 0 : index
    %4 = vector.load %arg3[%c0_4, %c0_5] : memref<256x1024xf32, #tpu.memory_space<vmem>>, vector<256x1024xf32>
    %cst_6 = arith.constant dense<0.000000e+00> : vector<8x1024xf32>
    %5 = tpu.matmul %3, %4, %cst_6 {dimension_numbers = #tpu.dot_dimension_numbers<[1], [0], [0], [1], [0, 0, 1, 1], [], []>} : vector<8x256xf32>, vector<256x1024xf32>, vector<8x1024xf32> -> vector<8x1024xf32>
    %c0_7 = arith.constant 0 : index
    %c0_8 = arith.constant 0 : index
    %c0_9 = arith.constant 0 : index
    %6 = vector.load %arg4[%c0_7, %c0_8, %c0_9] : memref<1x8x1024xf32, #tpu.memory_space<vmem>>, vector<1x8x1024xf32>
    %7 = vector.shape_cast %6 : vector<1x8x1024xf32> to vector<8x1024xf32>
    %8 = vector.shape_cast %5 : vector<8x1024xf32> to vector<1x8x1024xf32>
    tpu.vector_store %arg4[%c0_7, %c0_8, %c0_9], %8 {strides = array<i32>} : memref<1x8x1024xf32, #tpu.memory_space<vmem>>, vector<1x8x1024xf32>,
    return
  }
  func.func @transform_0(%arg0: i32) -> (i32, i32, i32) {
    %c0_i32 = arith.constant 0 : i32
    %c0_i32_0 = arith.constant 0 : i32
    %c0_i32_1 = arith.constant 0 : i32
    return %arg0, %c0_i32, %c0_i32_0 : i32, i32, i32
  }
  func.func @transform_1(%arg0: i32) -> (i32, i32) {
    %c0_i32 = arith.constant 0 : i32
    %c0_i32_0 = arith.constant 0 : i32
    %c0_i32_1 = arith.constant 0 : i32
    return %c0_i32, %c0_i32_0 : i32, i32
  }
  func.func @transform_2(%arg0: i32) -> (i32, i32) {
    %c0_i32 = arith.constant 0 : i32
    %c0_i32_0 = arith.constant 0 : i32
    %c0_i32_1 = arith.constant 0 : i32
    return %c0_i32, %c0_i32_0 : i32, i32
  }
  func.func @transform_3(%arg0: i32) -> (i32, i32, i32) {
    %c0_i32 = arith.constant 0 : i32
    %c0_i32_0 = arith.constant 0 : i32
    %c0_i32_1 = arith.constant 0 : i32
    return %arg0, %c0_i32, %c0_i32_0 : i32, i32, i32
  }
}

</mosaic_0001>

<bundles_post_ra>
// kernel: tpu_custom_call.1
= control target key start
LH: loop header
LB: loop body
LE: loop exit
PB: predicated region body
PF: predicated region fallthrough
CT: control target
= control target key end

     0   :  { %8 = vsyncpa [#allocation3], 0  ;;  %s783_s0 = inlined_call_operand.vmem [shape: f32[1,12,256], index: 0, kind: input, shape index: {}]   ;;  %s784_s1 = inlined_call_operand.vmem [shape: f32[8,12], index: 1, kind: input, shape index: {}]   ;;  %s785_s2 = inlined_call_operand.hbm [shape: f32[256,1024], index: 2, kind: input, shape index: {}]   ;;  %s786_s3 = inlined_call_operand.hbm [shape: f32[1,8,1024], index: 3, kind: output, shape index: {}]  }
   0x1   :  { %9 = vsyncpa [#allocation4], 0  ;;  %s731_s12 = smov [#allocation2]  }
   0x2   :  { %s19_s13 = sshll.u32 %s731_s12, 4  ;;  %s20_s13 = int_to_ptr.vmem [resolvable:$true] %s19_s13 }
   0x3   :  { %s695_s14 = scalar_lea.vmem %s20_s13, 32768  ;;  %p700_p1 = scmp.lt.s32.totalorder %s20_s13, %s20_s13 }
   0x4   :  { %p696_p0 = scmp.ne.s32.totalorder %s20_s13, %s695_s14  ;;  %p701_p2 = scmp.lt.s32.totalorder %s695_s14, %s695_s14 }
   0x6   :  { %p702_p3 = por %p701_p2, %p700_p1 }
   0x8   :  { %p703_p4 = pnand %p702_p3, %p696_p0 }
   0xa   :  { %706 = shalt.err (!%p703_p4)
}
   0xb   :  { %s732_s15 = smov 1024   ;;  %s733_s16 = smov 64  }
   0xc   :  { %25 = dma.hbm_to_vmem [thread:$0]  %s785_s2, 32768, %s20_s13, [#allocation3], %s732_s15, %s732_s15, %s733_s16  }
   0xd   :  { %727 = dma.done.wait [#allocation3], 32768  }
   0xe   :  { %728 = vsyncadd [#allocation3], 4294934528  ;;  %v734_v0 = vmov 0.0   ;;  %vm38_vm0 = vcmask 1043456   ;;  %v33_v1 = vld [vmem:[%s783_s0 + $0x18] sm:$0xf] }
   0xf   :  { %109 = vmatprep.mubr.f32.mxu0 %v734_v0  ;;  %v32_v2 = vld [vmem:[%s783_s0 + $0x10] sm:$0xf]  ;;  %v31_v3 = vld [vmem:[%s783_s0 + $0x8] sm:$0xff]  ;;  %679 = vmatprep.subr.msk.mxu0 %vm38_vm0, %v33_v1  ;;  %v30_v4 = vld [vmem:[%s783_s0] sm:$0xff]  ;;  %vm34_vm1 = vcmask 97280   ;;  %s735_s0 = smov [#allocation5]  }
  0x10   :  { %v237_v5 = vld [vmem:[#allocation2 + $0x3c8] sm:$0xff]  ;;  %680 = vmatpush1.msk.msra.mxu0 %vm38_vm0, %v32_v2  ;;  %v29_v6 = vld [vmem:[%s784_s1] sm:$0xff]  ;;  %v239_v7 = vld [vmem:[#allocation2 + $0x3d8] sm:$0xff]  ;;  %s670_s1 = sshll.u32 %s735_s0, 4  ;;  %s671_s1 = int_to_ptr.vmem [resolvable:$true] %s670_s1 }
  0x11   :  { %372 = vmatprep.subr.mxu1 %v237_v5  ;;  %v236_v8 = vld [vmem:[#allocation2 + $0x3c0] sm:$0xff]  ;;  %75 = vmatprep.subr.mxu0 %v31_v3  ;;  %v238_v9 = vld [vmem:[#allocation2 + $0x3d0] sm:$0xff]  ;;  %v229_v10 = vld [vmem:[#allocation2 + $0x388] sm:$0xff]  ;;  %s707_s28 = scalar_lea.vmem %s671_s1, 1024  ;;  %p712_p6 = scmp.lt.s32.totalorder %s671_s1, %s671_s1 }
  0x12   :  { %373 = vmatpush1.msra.mxu1 %v236_v8  ;;  %v228_v11 = vld [vmem:[#allocation2 + $0x380] sm:$0xff]  ;;  %76 = vmatpush1.msra.mxu0 %v30_v4  ;;  %v231_v12 = vld [vmem:[#allocation2 + $0x398] sm:$0xff]  ;;  %v221_v13 = vld [vmem:[#allocation2 + $0x348] sm:$0xff]  ;;  %p708_p5 = scmp.ne.s32.totalorder %s671_s1, %s707_s28  ;;  %p713_p7 = scmp.lt.s32.totalorder %s707_s28, %s707_s28 }
  0x13   :  { %374 = vmatprep.subr.mxu1 %v229_v10  ;;  %681 = vmatmul.mubr.msk.f32.vlgmr.msra.gmra.mxu0 %vm34_vm1, %v29_v6  ;;  %v230_v14 = vld [vmem:[#allocation2 + $0x390] sm:$0xff]  ;;  %v220_v15 = vld [vmem:[#allocation2 + $0x340] sm:$0xff]  ;;  %v223_v16 = vld [vmem:[#allocation2 + $0x358] sm:$0xff] }
  0x14   :  { %443 = vmatprep.subr.mxu0 %v239_v7  ;;  %375 = vmatpush1.msra.mxu1 %v228_v11  ;;  %v213_v17 = vld [vmem:[#allocation2 + $0x308] sm:$0xff]  ;;  %v222_v18 = vld [vmem:[#allocation2 + $0x350] sm:$0xff]  ;;  %v212_v19 = vld [vmem:[#allocation2 + $0x300] sm:$0xff]  ;;  %p714_p8 = por %p713_p7, %p712_p6 }
  0x15   :  { %444 = vmatpush1.msra.mxu0 %v238_v9  ;;  %376 = vmatprep.subr.mxu1 %v221_v13  ;;  %v215_v20 = vld [vmem:[#allocation2 + $0x318] sm:$0xff]  ;;  %v205_v21 = vld [vmem:[#allocation2 + $0x2c8] sm:$0xff]  ;;  %v214_v22 = vld [vmem:[#allocation2 + $0x310] sm:$0xff] }
  0x16   :  { %445 = vmatprep.subr.mxu0 %v231_v12  ;;  %377 = vmatpush1.msra.mxu1 %v220_v15  ;;  %v204_v23 = vld [vmem:[#allocation2 + $0x2c0] sm:$0xff]  ;;  %v207_v24 = vld [vmem:[#allocation2 + $0x2d8] sm:$0xff]  ;;  %v197_v25 = vld [vmem:[#allocation2 + $0x288] sm:$0xff]  ;;  %p715_p9 = pnand %p714_p8, %p708_p5 }
  0x17   :  { %446 = vmatpush1.msra.mxu0 %v230_v14  ;;  %378 = vmatprep.subr.mxu1 %v213_v17  ;;  %v206_v26 = vld [vmem:[#allocation2 + $0x2d0] sm:$0xff]  ;;  %v196_v27 = vld [vmem:[#allocation2 + $0x280] sm:$0xff]  ;;  %v199_v28 = vld [vmem:[#allocation2 + $0x298] sm:$0xff] }
  0x18   :  { %447 = vmatprep.subr.mxu0 %v223_v16  ;;  %379 = vmatpush1.msra.mxu1 %v212_v19  ;;  %v189_v29 = vld [vmem:[#allocation2 + $0x248] sm:$0xff]  ;;  %v198_v30 = vld [vmem:[#allocation2 + $0x290] sm:$0xff]  ;;  %v188_v31 = vld [vmem:[#allocation2 + $0x240] sm:$0xff] }
  0x19   :  { %448 = vmatpush1.msra.mxu0 %v222_v18  ;;  %380 = vmatprep.subr.mxu1 %v205_v21  ;;  %v191_v32 = vld [vmem:[#allocation2 + $0x258] sm:$0xff]  ;;  %v181_v33 = vld [vmem:[#allocation2 + $0x208] sm:$0xff]  ;;  %v190_v34 = vld [vmem:[#allocation2 + $0x250] sm:$0xff] }
  0x1a   :  { %449 = vmatprep.subr.mxu0 %v215_v20  ;;  %381 = vmatpush1.msra.mxu1 %v204_v23  ;;  %v180_v35 = vld [vmem:[#allocation2 + $0x200] sm:$0xff]  ;;  %v183_v36 = vld [vmem:[#allocation2 + $0x218] sm:$0xff]  ;;  %v173_v37 = vld [vmem:[#allocation2 + $0x1c8] sm:$0xff] }
  0x1b   :  { %450 = vmatpush1.msra.mxu0 %v214_v22  ;;  %382 = vmatprep.subr.mxu1 %v197_v25  ;;  %v182_v38 = vld [vmem:[#allocation2 + $0x210] sm:$0xff]  ;;  %v172_v39 = vld [vmem:[#allocation2 + $0x1c0] sm:$0xff]  ;;  %v175_v40 = vld [vmem:[#allocation2 + $0x1d8] sm:$0xff] }
  0x1c   :  { %451 = vmatprep.subr.mxu0 %v207_v24  ;;  %383 = vmatpush1.msra.mxu1 %v196_v27  ;;  %v165_v41 = vld [vmem:[#allocation2 + $0x188] sm:$0xff]  ;;  %v174_v42 = vld [vmem:[#allocation2 + $0x1d0] sm:$0xff]  ;;  %v164_v43 = vld [vmem:[#allocation2 + $0x180] sm:$0xff] }
  0x1d   :  { %452 = vmatpush1.msra.mxu0 %v206_v26  ;;  %384 = vmatprep.subr.mxu1 %v189_v29  ;;  %v167_v44 = vld [vmem:[#allocation2 + $0x198] sm:$0xff]  ;;  %v157_v45 = vld [vmem:[#allocation2 + $0x148] sm:$0xff]  ;;  %v166_v46 = vld [vmem:[#allocation2 + $0x190] sm:$0xff] }
  0x1e   :  { %453 = vmatprep.subr.mxu0 %v199_v28  ;;  %385 = vmatpush1.msra.mxu1 %v188_v31  ;;  %v156_v47 = vld [vmem:[#allocation2 + $0x140] sm:$0xff]  ;;  %v159_v48 = vld [vmem:[#allocation2 + $0x158] sm:$0xff]  ;;  %v149_v49 = vld [vmem:[#allocation2 + $0x108] sm:$0xff] }
  0x1f   :  { %454 = vmatpush1.msra.mxu0 %v198_v30  ;;  %386 = vmatprep.subr.mxu1 %v181_v33  ;;  %v158_v50 = vld [vmem:[#allocation2 + $0x150] sm:$0xff]  ;;  %v148_v51 = vld [vmem:[#allocation2 + $0x100] sm:$0xff]  ;;  %v151_v52 = vld [vmem:[#allocation2 + $0x118] sm:$0xff] }
  0x20   :  { %455 = vmatprep.subr.mxu0 %v191_v32  ;;  %387 = vmatpush1.msra.mxu1 %v180_v35  ;;  %v141_v53 = vld [vmem:[#allocation2 + $0xc8] sm:$0xff]  ;;  %v150_v54 = vld [vmem:[#allocation2 + $0x110] sm:$0xff]  ;;  %v140_v55 = vld [vmem:[#allocation2 + $0xc0] sm:$0xff] }
  0x21   :  { %456 = vmatpush1.msra.mxu0 %v190_v34  ;;  %388 = vmatprep.subr.mxu1 %v173_v37  ;;  %v143_v56 = vld [vmem:[#allocation2 + $0xd8] sm:$0xff]  ;;  %v133_v57 = vld [vmem:[#allocation2 + $0x88] sm:$0xff]  ;;  %v142_v58 = vld [vmem:[#allocation2 + $0xd0] sm:$0xff] }
  0x22   :  { %457 = vmatprep.subr.mxu0 %v183_v36  ;;  %389 = vmatpush1.msra.mxu1 %v172_v39  ;;  %v132_v59 = vld [vmem:[#allocation2 + $0x80] sm:$0xff]  ;;  %v135_v60 = vld [vmem:[#allocation2 + $0x98] sm:$0xff]  ;;  %v125_v61 = vld [vmem:[#allocation2 + $0x48] sm:$0xff] }
  0x23   :  { %458 = vmatpush1.msra.mxu0 %v182_v38  ;;  %390 = vmatprep.subr.mxu1 %v165_v41  ;;  %v134_v62 = vld [vmem:[#allocation2 + $0x90] sm:$0xff]  ;;  %v124_v63 = vld [vmem:[#allocation2 + $0x40] sm:$0xff]  ;;  %v127_v0 = vld [vmem:[#allocation2 + $0x58] sm:$0xff] }
  0x24   :  { %459 = vmatprep.subr.mxu0 %v175_v40  ;;  %391 = vmatpush1.msra.mxu1 %v164_v43  ;;  %v117_v1 = vld [vmem:[#allocation2 + $0x8] sm:$0xff]  ;;  %v126_v2 = vld [vmem:[#allocation2 + $0x50] sm:$0xff]  ;;  %v116_v3 = vld [vmem:[#allocation2] sm:$0xff] }
  0x25   :  { %460 = vmatpush1.msra.mxu0 %v174_v42  ;;  %392 = vmatprep.subr.mxu1 %v157_v45  ;;  %v119_v4 = vld [vmem:[#allocation2 + $0x18] sm:$0xff]  ;;  %v365_v5 = vld [vmem:[#allocation2 + $0x7c8] sm:$0xff]  ;;  %v118_v6 = vld [vmem:[#allocation2 + $0x10] sm:$0xff] }
  0x26   :  { %461 = vmatprep.subr.mxu0 %v167_v44  ;;  %393 = vmatpush1.msra.mxu1 %v156_v47  ;;  %v364_v7 = vld [vmem:[#allocation2 + $0x7c0] sm:$0xff]  ;;  %v367_v8 = vld [vmem:[#allocation2 + $0x7d8] sm:$0xff]  ;;  %v357_v9 = vld [vmem:[#allocation2 + $0x788] sm:$0xff] }
  0x27   :  { %462 = vmatpush1.msra.mxu0 %v166_v46  ;;  %394 = vmatprep.subr.mxu1 %v149_v49  ;;  %v366_v10 = vld [vmem:[#allocation2 + $0x7d0] sm:$0xff]  ;;  %v356_v11 = vld [vmem:[#allocation2 + $0x780] sm:$0xff]  ;;  %v359_v12 = vld [vmem:[#allocation2 + $0x798] sm:$0xff] }
  0x28   :  { %463 = vmatprep.subr.mxu0 %v159_v48  ;;  %395 = vmatpush1.msra.mxu1 %v148_v51  ;;  %v349_v13 = vld [vmem:[#allocation2 + $0x748] sm:$0xff]  ;;  %v358_v14 = vld [vmem:[#allocation2 + $0x790] sm:$0xff]  ;;  %v348_v15 = vld [vmem:[#allocation2 + $0x740] sm:$0xff] }
  0x29   :  { %464 = vmatpush1.msra.mxu0 %v158_v50  ;;  %396 = vmatprep.subr.mxu1 %v141_v53  ;;  %v351_v16 = vld [vmem:[#allocation2 + $0x758] sm:$0xff]  ;;  %v341_v17 = vld [vmem:[#allocation2 + $0x708] sm:$0xff]  ;;  %v350_v18 = vld [vmem:[#allocation2 + $0x750] sm:$0xff] }
  0x2a   :  { %465 = vmatprep.subr.mxu0 %v151_v52  ;;  %397 = vmatpush1.msra.mxu1 %v140_v55  ;;  %v340_v19 = vld [vmem:[#allocation2 + $0x700] sm:$0xff]  ;;  %v343_v20 = vld [vmem:[#allocation2 + $0x718] sm:$0xff]  ;;  %v333_v21 = vld [vmem:[#allocation2 + $0x6c8] sm:$0xff] }
  0x2b   :  { %466 = vmatpush1.msra.mxu0 %v150_v54  ;;  %398 = vmatprep.subr.mxu1 %v133_v57  ;;  %v342_v22 = vld [vmem:[#allocation2 + $0x710] sm:$0xff]  ;;  %v332_v23 = vld [vmem:[#allocation2 + $0x6c0] sm:$0xff]  ;;  %v335_v24 = vld [vmem:[#allocation2 + $0x6d8] sm:$0xff] }
  0x2c   :  { %467 = vmatprep.subr.mxu0 %v143_v56  ;;  %399 = vmatpush1.msra.mxu1 %v132_v59  ;;  %v325_v25 = vld [vmem:[#allocation2 + $0x688] sm:$0xff]  ;;  %v334_v26 = vld [vmem:[#allocation2 + $0x6d0] sm:$0xff]  ;;  %v324_v27 = vld [vmem:[#allocation2 + $0x680] sm:$0xff] }
  0x2d   :  { %468 = vmatpush1.msra.mxu0 %v142_v58  ;;  %400 = vmatprep.subr.mxu1 %v125_v61  ;;  %v327_v28 = vld [vmem:[#allocation2 + $0x698] sm:$0xff]  ;;  %v317_v29 = vld [vmem:[#allocation2 + $0x648] sm:$0xff]  ;;  %v326_v30 = vld [vmem:[#allocation2 + $0x690] sm:$0xff] }
  0x2e   :  { %469 = vmatprep.subr.mxu0 %v135_v60  ;;  %401 = vmatpush1.msra.mxu1 %v124_v63  ;;  %v316_v31 = vld [vmem:[#allocation2 + $0x640] sm:$0xff]  ;;  %v319_v32 = vld [vmem:[#allocation2 + $0x658] sm:$0xff]  ;;  %v309_v33 = vld [vmem:[#allocation2 + $0x608] sm:$0xff] }
  0x2f   :  { %470 = vmatpush1.msra.mxu0 %v134_v62  ;;  %402 = vmatprep.subr.mxu1 %v117_v1  ;;  %v318_v34 = vld [vmem:[#allocation2 + $0x650] sm:$0xff]  ;;  %v308_v35 = vld [vmem:[#allocation2 + $0x600] sm:$0xff]  ;;  %v311_v36 = vld [vmem:[#allocation2 + $0x618] sm:$0xff] }
  0x30   :  { %471 = vmatprep.subr.mxu0 %v127_v0  ;;  %403 = vmatpush1.msra.mxu1 %v116_v3  ;;  %v301_v37 = vld [vmem:[#allocation2 + $0x5c8] sm:$0xff]  ;;  %v310_v38 = vld [vmem:[#allocation2 + $0x610] sm:$0xff]  ;;  %v300_v39 = vld [vmem:[#allocation2 + $0x5c0] sm:$0xff] }
  0x31   :  { %472 = vmatpush1.msra.mxu0 %v126_v2  ;;  %404 = vmatprep.subr.mxu1 %v365_v5  ;;  %v303_v40 = vld [vmem:[#allocation2 + $0x5d8] sm:$0xff]  ;;  %v293_v41 = vld [vmem:[#allocation2 + $0x588] sm:$0xff]  ;;  %v302_v42 = vld [vmem:[#allocation2 + $0x5d0] sm:$0xff] }
  0x32   :  { %473 = vmatprep.subr.mxu0 %v119_v4  ;;  %405 = vmatpush2.msra.mxu1 %v364_v7  ;;  %v292_v43 = vld [vmem:[#allocation2 + $0x580] sm:$0xff]  ;;  %v295_v44 = vld [vmem:[#allocation2 + $0x598] sm:$0xff]  ;;  %v285_v45 = vld [vmem:[#allocation2 + $0x548] sm:$0xff] }
  0x33   :  { %474 = vmatpush1.msra.mxu0 %v118_v6  ;;  %406 = vmatprep.subr.mxu1 %v357_v9  ;;  %v294_v46 = vld [vmem:[#allocation2 + $0x590] sm:$0xff]  ;;  %v284_v47 = vld [vmem:[#allocation2 + $0x540] sm:$0xff]  ;;  %v287_v48 = vld [vmem:[#allocation2 + $0x558] sm:$0xff] }
  0x34   :  { %475 = vmatprep.subr.mxu0 %v367_v8  ;;  %407 = vmatpush2.msra.mxu1 %v356_v11  ;;  %v277_v49 = vld [vmem:[#allocation2 + $0x508] sm:$0xff]  ;;  %v286_v50 = vld [vmem:[#allocation2 + $0x550] sm:$0xff]  ;;  %v276_v51 = vld [vmem:[#allocation2 + $0x500] sm:$0xff] }
  0x35   :  { %476 = vmatpush2.msra.mxu0 %v366_v10  ;;  %408 = vmatprep.subr.mxu1 %v349_v13  ;;  %v279_v52 = vld [vmem:[#allocation2 + $0x518] sm:$0xff]  ;;  %v269_v53 = vld [vmem:[#allocation2 + $0x4c8] sm:$0xff]  ;;  %v278_v54 = vld [vmem:[#allocation2 + $0x510] sm:$0xff] }
  0x36   :  { %477 = vmatprep.subr.mxu0 %v359_v12  ;;  %409 = vmatpush2.msra.mxu1 %v348_v15  ;;  %v268_v55 = vld [vmem:[#allocation2 + $0x4c0] sm:$0xff]  ;;  %v271_v56 = vld [vmem:[#allocation2 + $0x4d8] sm:$0xff]  ;;  %v261_v57 = vld [vmem:[#allocation2 + $0x488] sm:$0xff] }
  0x37   :  { %478 = vmatpush2.msra.mxu0 %v358_v14  ;;  %410 = vmatprep.subr.mxu1 %v341_v17  ;;  %v270_v58 = vld [vmem:[#allocation2 + $0x4d0] sm:$0xff]  ;;  %v260_v59 = vld [vmem:[#allocation2 + $0x480] sm:$0xff]  ;;  %v263_v60 = vld [vmem:[#allocation2 + $0x498] sm:$0xff] }
  0x38   :  { %479 = vmatprep.subr.mxu0 %v351_v16  ;;  %411 = vmatpush2.msra.mxu1 %v340_v19  ;;  %v253_v61 = vld [vmem:[#allocation2 + $0x448] sm:$0xff]  ;;  %v262_v62 = vld [vmem:[#allocation2 + $0x490] sm:$0xff]  ;;  %v255_v63 = vld [vmem:[#allocation2 + $0x458] sm:$0xff] }
  0x39   :  { %480 = vmatpush2.msra.mxu0 %v350_v18  ;;  %412 = vmatprep.subr.mxu1 %v333_v21  ;;  %v252_v0 = vld [vmem:[#allocation2 + $0x440] sm:$0xff]  ;;  %v254_v1 = vld [vmem:[#allocation2 + $0x450] sm:$0xff]  ;;  %v245_v2 = vld [vmem:[#allocation2 + $0x408] sm:$0xff] }
  0x3a   :  { %481 = vmatprep.subr.mxu0 %v343_v20  ;;  %413 = vmatpush2.msra.mxu1 %v332_v23  ;;  %v247_v3 = vld [vmem:[#allocation2 + $0x418] sm:$0xff]  ;;  %v244_v4 = vld [vmem:[#allocation2 + $0x400] sm:$0xff]  ;;  %v246_v5 = vld [vmem:[#allocation2 + $0x410] sm:$0xff] }
  0x3b   :  { %482 = vmatpush2.msra.mxu0 %v342_v22  ;;  %414 = vmatprep.subr.mxu1 %v325_v25  ;;  %v241_v6 = vld [vmem:[#allocation2 + $0x3e8] sm:$0xff]  ;;  %v243_v7 = vld [vmem:[#allocation2 + $0x3f8] sm:$0xff]  ;;  %v240_v10 = vld [vmem:[#allocation2 + $0x3e0] sm:$0xff] }
  0x3c   :  { %483 = vmatprep.subr.mxu0 %v335_v24  ;;  %415 = vmatpush2.msra.mxu1 %v324_v27  ;;  %v242_v11 = vld [vmem:[#allocation2 + $0x3f0] sm:$0xff]  ;;  %v233_v12 = vld [vmem:[#allocation2 + $0x3a8] sm:$0xff]  ;;  %v235_v13 = vld [vmem:[#allocation2 + $0x3b8] sm:$0xff] }
  0x3d   :  { %484 = vmatpush2.msra.mxu0 %v334_v26  ;;  %416 = vmatprep.subr.mxu1 %v317_v29  ;;  %v232_v14 = vld [vmem:[#allocation2 + $0x3a0] sm:$0xff]  ;;  %v234_v15 = vld [vmem:[#allocation2 + $0x3b0] sm:$0xff]  ;;  %v225_v16 = vld [vmem:[#allocation2 + $0x368] sm:$0xff] }
  0x3e   :  { %485 = vmatprep.subr.mxu0 %v327_v28  ;;  %417 = vmatpush2.msra.mxu1 %v316_v31  ;;  %v227_v17 = vld [vmem:[#allocation2 + $0x378] sm:$0xff]  ;;  %v224_v18 = vld [vmem:[#allocation2 + $0x360] sm:$0xff]  ;;  %v226_v19 = vld [vmem:[#allocation2 + $0x370] sm:$0xff] }
  0x3f   :  { %486 = vmatpush2.msra.mxu0 %v326_v30  ;;  %418 = vmatprep.subr.mxu1 %v309_v33  ;;  %v217_v20 = vld [vmem:[#allocation2 + $0x328] sm:$0xff]  ;;  %v219_v21 = vld [vmem:[#allocation2 + $0x338] sm:$0xff]  ;;  %v216_v22 = vld [vmem:[#allocation2 + $0x320] sm:$0xff] }
  0x40   :  { %487 = vmatprep.subr.mxu0 %v319_v32  ;;  %419 = vmatpush2.msra.mxu1 %v308_v35  ;;  %v218_v23 = vld [vmem:[#allocation2 + $0x330] sm:$0xff]  ;;  %v209_v24 = vld [vmem:[#allocation2 + $0x2e8] sm:$0xff]  ;;  %v211_v25 = vld [vmem:[#allocation2 + $0x2f8] sm:$0xff] }
  0x41   :  { %488 = vmatpush2.msra.mxu0 %v318_v34  ;;  %420 = vmatprep.subr.mxu1 %v301_v37  ;;  %v208_v26 = vld [vmem:[#allocation2 + $0x2e0] sm:$0xff]  ;;  %v210_v27 = vld [vmem:[#allocation2 + $0x2f0] sm:$0xff]  ;;  %v201_v28 = vld [vmem:[#allocation2 + $0x2a8] sm:$0xff] }
  0x42   :  { %489 = vmatprep.subr.mxu0 %v311_v36  ;;  %421 = vmatpush2.msra.mxu1 %v300_v39  ;;  %v203_v29 = vld [vmem:[#allocation2 + $0x2b8] sm:$0xff]  ;;  %v200_v30 = vld [vmem:[#allocation2 + $0x2a0] sm:$0xff]  ;;  %v202_v31 = vld [vmem:[#allocation2 + $0x2b0] sm:$0xff] }
  0x43   :  { %490 = vmatpush2.msra.mxu0 %v310_v38  ;;  %422 = vmatprep.subr.mxu1 %v293_v41  ;;  %v193_v32 = vld [vmem:[#allocation2 + $0x268] sm:$0xff]  ;;  %v195_v33 = vld [vmem:[#allocation2 + $0x278] sm:$0xff]  ;;  %v192_v34 = vld [vmem:[#allocation2 + $0x260] sm:$0xff] }
  0x44   :  { %491 = vmatprep.subr.mxu0 %v303_v40  ;;  %423 = vmatpush2.msra.mxu1 %v292_v43  ;;  %v194_v35 = vld [vmem:[#allocation2 + $0x270] sm:$0xff]  ;;  %v185_v36 = vld [vmem:[#allocation2 + $0x228] sm:$0xff]  ;;  %v187_v37 = vld [vmem:[#allocation2 + $0x238] sm:$0xff] }
  0x45   :  { %492 = vmatpush2.msra.mxu0 %v302_v42  ;;  %424 = vmatprep.subr.mxu1 %v285_v45  ;;  %v184_v38 = vld [vmem:[#allocation2 + $0x220] sm:$0xff]  ;;  %v186_v39 = vld [vmem:[#allocation2 + $0x230] sm:$0xff]  ;;  %v177_v40 = vld [vmem:[#allocation2 + $0x1e8] sm:$0xff] }
  0x46   :  { %493 = vmatprep.subr.mxu0 %v295_v44  ;;  %425 = vmatpush2.msra.mxu1 %v284_v47  ;;  %v179_v41 = vld [vmem:[#allocation2 + $0x1f8] sm:$0xff]  ;;  %v176_v42 = vld [vmem:[#allocation2 + $0x1e0] sm:$0xff]  ;;  %v178_v43 = vld [vmem:[#allocation2 + $0x1f0] sm:$0xff] }
  0x47   :  { %494 = vmatpush2.msra.mxu0 %v294_v46  ;;  %426 = vmatprep.subr.mxu1 %v277_v49  ;;  %v169_v44 = vld [vmem:[#allocation2 + $0x1a8] sm:$0xff]  ;;  %v171_v45 = vld [vmem:[#allocation2 + $0x1b8] sm:$0xff]  ;;  %v168_v46 = vld [vmem:[#allocation2 + $0x1a0] sm:$0xff] }
  0x48   :  { %495 = vmatprep.subr.mxu0 %v287_v48  ;;  %427 = vmatpush2.msra.mxu1 %v276_v51  ;;  %v170_v47 = vld [vmem:[#allocation2 + $0x1b0] sm:$0xff]  ;;  %v161_v48 = vld [vmem:[#allocation2 + $0x168] sm:$0xff]  ;;  %v163_v49 = vld [vmem:[#allocation2 + $0x178] sm:$0xff] }
  0x49   :  { %496 = vmatpush2.msra.mxu0 %v286_v50  ;;  %428 = vmatprep.subr.mxu1 %v269_v53  ;;  %v160_v50 = vld [vmem:[#allocation2 + $0x160] sm:$0xff]  ;;  %v162_v51 = vld [vmem:[#allocation2 + $0x170] sm:$0xff]  ;;  %v155_v53 = vld [vmem:[#allocation2 + $0x138] sm:$0xff] }
  0x4a   :  { %497 = vmatprep.subr.mxu0 %v279_v52  ;;  %429 = vmatpush2.msra.mxu1 %v268_v55  ;;  %v153_v52 = vld [vmem:[#allocation2 + $0x128] sm:$0xff]  ;;  %v154_v55 = vld [vmem:[#allocation2 + $0x130] sm:$0xff] }
  0x4b   :  { %498 = vmatpush2.msra.mxu0 %v278_v54  ;;  %430 = vmatprep.subr.mxu1 %v261_v57  ;;  %v152_v54 = vld [vmem:[#allocation2 + $0x120] sm:$0xff]  ;;  %v147_v57 = vld [vmem:[#allocation2 + $0xf8] sm:$0xff] }
  0x4c   :  { %499 = vmatprep.subr.mxu0 %v271_v56  ;;  %431 = vmatpush2.msra.mxu1 %v260_v59  ;;  %v145_v56 = vld [vmem:[#allocation2 + $0xe8] sm:$0xff]  ;;  %v146_v59 = vld [vmem:[#allocation2 + $0xf0] sm:$0xff] }
  0x4d   :  { %500 = vmatpush2.msra.mxu0 %v270_v58  ;;  %432 = vmatprep.subr.mxu1 %v253_v61  ;;  %v144_v58 = vld [vmem:[#allocation2 + $0xe0] sm:$0xff]  ;;  %v139_v61 = vld [vmem:[#allocation2 + $0xb8] sm:$0xff] }
  0x4e   :  { %501 = vmatprep.subr.mxu0 %v263_v60  ;;  %433 = vmatpush2.msra.mxu1 %v252_v0  ;;  %v137_v60 = vld [vmem:[#allocation2 + $0xa8] sm:$0xff] }
  0x4f   :  { %502 = vmatpush2.msra.mxu0 %v262_v62  ;;  %434 = vmatprep.subr.mxu1 %v245_v2  ;;  %v136_v62 = vld [vmem:[#allocation2 + $0xa0] sm:$0xff]  ;;  %v129_v0 = vld [vmem:[#allocation2 + $0x68] sm:$0xff] }
  0x50   :  { %503 = vmatprep.subr.mxu0 %v255_v63  ;;  %435 = vmatpush2.msra.mxu1 %v244_v4  ;;  %v138_v63 = vld [vmem:[#allocation2 + $0xb0] sm:$0xff]  ;;  %v128_v2 = vld [vmem:[#allocation2 + $0x60] sm:$0xff]  ;;  %v121_v4 = vld [vmem:[#allocation2 + $0x28] sm:$0xff] }
  0x51   :  { %504 = vmatpush2.msra.mxu0 %v254_v1  ;;  %514 = vmatprep.subr.mxu1 %v241_v6  ;;  %v131_v1 = vld [vmem:[#allocation2 + $0x78] sm:$0xff]  ;;  %v120_v6 = vld [vmem:[#allocation2 + $0x20] sm:$0xff] }
  0x52   :  { %505 = vmatprep.subr.mxu0 %v247_v3  ;;  %v130_v3 = vld [vmem:[#allocation2 + $0x70] sm:$0xff] }
  0x53   :  { %506 = vmatpush2.msra.mxu0 %v246_v5  ;;  %v123_v5 = vld [vmem:[#allocation2 + $0x38] sm:$0xff] }
  0x54   :  { %585 = vmatprep.subr.mxu0 %v243_v7  ;;  %v122_v7 = vld [vmem:[#allocation2 + $0x30] sm:$0xff] }
  0xd3   :  { %v774_v8 = vpop.f32.mrf.mxu0 }
  0xd5   :  { %v113_v9 = vpop.f32.mrf.mxu0 }
  0xd6   :  { %436 = vmatprep.mubr.f32.mxu1 %v113_v9  ;;  %507 = vmatprep.mubr.f32.mxu0 %v113_v9 }
  0xd7   :  { %437 = vmatmul.mubr.f32.vlgmr.msra.gmra.mxu1 %v774_v8  ;;  %508 = vmatmul.mubr.f32.vlgmr.msra.gmra.mxu0 %v774_v8 }
  0xd8   :  { %515 = vmatpush1.msra.mxu1 %v240_v10  ;;  %586 = vmatpush1.msra.mxu0 %v242_v11  ;;  %v371_v10 = vld [vmem:[#allocation2 + $0x7f8] sm:$0xff]  ;;  %v368_v11 = vld [vmem:[#allocation2 + $0x7e0] sm:$0xff] }
  0xd9   :  { %516 = vmatprep.subr.mxu1 %v233_v12  ;;  %578 = vmatprep.mubr.f32.mxu1 %v113_v9  ;;  %v370_v12 = vld [vmem:[#allocation2 + $0x7f0] sm:$0xff] }
  0xda   :  { %587 = vmatprep.subr.mxu0 %v235_v13  ;;  %649 = vmatprep.mubr.f32.mxu0 %v113_v9  ;;  %v369_v9 = vld [vmem:[#allocation2 + $0x7e8] sm:$0xff] }
  0xdb   :  { %517 = vmatpush1.msra.mxu1 %v232_v14  ;;  %588 = vmatpush1.msra.mxu0 %v234_v15  ;;  %v361_v13 = vld [vmem:[#allocation2 + $0x7a8] sm:$0xff]  ;;  %v363_v14 = vld [vmem:[#allocation2 + $0x7b8] sm:$0xff]  ;;  %v360_v15 = vld [vmem:[#allocation2 + $0x7a0] sm:$0xff] }
  0xdc   :  { %518 = vmatprep.subr.mxu1 %v225_v16  ;;  %589 = vmatprep.subr.mxu0 %v227_v17  ;;  %v362_v16 = vld [vmem:[#allocation2 + $0x7b0] sm:$0xff]  ;;  %v353_v17 = vld [vmem:[#allocation2 + $0x768] sm:$0xff] }
  0xdd   :  { %519 = vmatpush1.msra.mxu1 %v224_v18  ;;  %590 = vmatpush1.msra.mxu0 %v226_v19  ;;  %v355_v18 = vld [vmem:[#allocation2 + $0x778] sm:$0xff]  ;;  %v352_v19 = vld [vmem:[#allocation2 + $0x760] sm:$0xff] }
  0xde   :  { %520 = vmatprep.subr.mxu1 %v217_v20  ;;  %591 = vmatprep.subr.mxu0 %v219_v21  ;;  %v354_v20 = vld [vmem:[#allocation2 + $0x770] sm:$0xff]  ;;  %v345_v21 = vld [vmem:[#allocation2 + $0x728] sm:$0xff] }
  0xdf   :  { %521 = vmatpush1.msra.mxu1 %v216_v22  ;;  %592 = vmatpush1.msra.mxu0 %v218_v23  ;;  %v347_v22 = vld [vmem:[#allocation2 + $0x738] sm:$0xff]  ;;  %v344_v23 = vld [vmem:[#allocation2 + $0x720] sm:$0xff] }
  0xe0   :  { %522 = vmatprep.subr.mxu1 %v209_v24  ;;  %593 = vmatprep.subr.mxu0 %v211_v25  ;;  %v346_v24 = vld [vmem:[#allocation2 + $0x730] sm:$0xff]  ;;  %v337_v25 = vld [vmem:[#allocation2 + $0x6e8] sm:$0xff] }
  0xe1   :  { %523 = vmatpush1.msra.mxu1 %v208_v26  ;;  %594 = vmatpush1.msra.mxu0 %v210_v27  ;;  %v339_v26 = vld [vmem:[#allocation2 + $0x6f8] sm:$0xff]  ;;  %v336_v27 = vld [vmem:[#allocation2 + $0x6e0] sm:$0xff] }
  0xe2   :  { %524 = vmatprep.subr.mxu1 %v201_v28  ;;  %595 = vmatprep.subr.mxu0 %v203_v29  ;;  %v338_v28 = vld [vmem:[#allocation2 + $0x6f0] sm:$0xff]  ;;  %v329_v29 = vld [vmem:[#allocation2 + $0x6a8] sm:$0xff] }
  0xe3   :  { %525 = vmatpush1.msra.mxu1 %v200_v30  ;;  %596 = vmatpush1.msra.mxu0 %v202_v31  ;;  %v331_v30 = vld [vmem:[#allocation2 + $0x6b8] sm:$0xff]  ;;  %v328_v31 = vld [vmem:[#allocation2 + $0x6a0] sm:$0xff] }
  0xe4   :  { %526 = vmatprep.subr.mxu1 %v193_v32  ;;  %597 = vmatprep.subr.mxu0 %v195_v33  ;;  %v330_v32 = vld [vmem:[#allocation2 + $0x6b0] sm:$0xff]  ;;  %v321_v33 = vld [vmem:[#allocation2 + $0x668] sm:$0xff] }
  0xe5   :  { %527 = vmatpush1.msra.mxu1 %v192_v34  ;;  %598 = vmatpush1.msra.mxu0 %v194_v35  ;;  %v323_v34 = vld [vmem:[#allocation2 + $0x678] sm:$0xff]  ;;  %v320_v35 = vld [vmem:[#allocation2 + $0x660] sm:$0xff] }
  0xe6   :  { %528 = vmatprep.subr.mxu1 %v185_v36  ;;  %599 = vmatprep.subr.mxu0 %v187_v37  ;;  %v322_v36 = vld [vmem:[#allocation2 + $0x670] sm:$0xff]  ;;  %v313_v37 = vld [vmem:[#allocation2 + $0x628] sm:$0xff] }
  0xe7   :  { %529 = vmatpush1.msra.mxu1 %v184_v38  ;;  %600 = vmatpush1.msra.mxu0 %v186_v39  ;;  %v315_v38 = vld [vmem:[#allocation2 + $0x638] sm:$0xff]  ;;  %v312_v39 = vld [vmem:[#allocation2 + $0x620] sm:$0xff] }
  0xe8   :  { %530 = vmatprep.subr.mxu1 %v177_v40  ;;  %601 = vmatprep.subr.mxu0 %v179_v41  ;;  %v314_v40 = vld [vmem:[#allocation2 + $0x630] sm:$0xff]  ;;  %v305_v41 = vld [vmem:[#allocation2 + $0x5e8] sm:$0xff] }
  0xe9   :  { %531 = vmatpush1.msra.mxu1 %v176_v42  ;;  %602 = vmatpush1.msra.mxu0 %v178_v43  ;;  %v307_v42 = vld [vmem:[#allocation2 + $0x5f8] sm:$0xff]  ;;  %v304_v43 = vld [vmem:[#allocation2 + $0x5e0] sm:$0xff] }
  0xea   :  { %532 = vmatprep.subr.mxu1 %v169_v44  ;;  %603 = vmatprep.subr.mxu0 %v171_v45  ;;  %v306_v44 = vld [vmem:[#allocation2 + $0x5f0] sm:$0xff]  ;;  %v297_v45 = vld [vmem:[#allocation2 + $0x5a8] sm:$0xff] }
  0xeb   :  { %533 = vmatpush1.msra.mxu1 %v168_v46  ;;  %604 = vmatpush1.msra.mxu0 %v170_v47  ;;  %v299_v46 = vld [vmem:[#allocation2 + $0x5b8] sm:$0xff]  ;;  %v296_v47 = vld [vmem:[#allocation2 + $0x5a0] sm:$0xff] }
  0xec   :  { %534 = vmatprep.subr.mxu1 %v161_v48  ;;  %605 = vmatprep.subr.mxu0 %v163_v49  ;;  %v298_v48 = vld [vmem:[#allocation2 + $0x5b0] sm:$0xff]  ;;  %v289_v49 = vld [vmem:[#allocation2 + $0x568] sm:$0xff] }
  0xed   :  { %535 = vmatpush1.msra.mxu1 %v160_v50  ;;  %606 = vmatpush1.msra.mxu0 %v162_v51  ;;  %v291_v50 = vld [vmem:[#allocation2 + $0x578] sm:$0xff]  ;;  %v288_v51 = vld [vmem:[#allocation2 + $0x560] sm:$0xff] }
  0xee   :  { %536 = vmatprep.subr.mxu1 %v153_v52  ;;  %607 = vmatprep.subr.mxu0 %v155_v53  ;;  %v290_v52 = vld [vmem:[#allocation2 + $0x570] sm:$0xff]  ;;  %v281_v53 = vld [vmem:[#allocation2 + $0x528] sm:$0xff] }
  0xef   :  { %537 = vmatpush1.msra.mxu1 %v152_v54  ;;  %608 = vmatpush1.msra.mxu0 %v154_v55  ;;  %v283_v54 = vld [vmem:[#allocation2 + $0x538] sm:$0xff]  ;;  %v280_v55 = vld [vmem:[#allocation2 + $0x520] sm:$0xff] }
  0xf0   :  { %538 = vmatprep.subr.mxu1 %v145_v56  ;;  %609 = vmatprep.subr.mxu0 %v147_v57  ;;  %v282_v56 = vld [vmem:[#allocation2 + $0x530] sm:$0xff]  ;;  %v273_v57 = vld [vmem:[#allocation2 + $0x4e8] sm:$0xff] }
  0xf1   :  { %539 = vmatpush1.msra.mxu1 %v144_v58  ;;  %610 = vmatpush1.msra.mxu0 %v146_v59  ;;  %v275_v58 = vld [vmem:[#allocation2 + $0x4f8] sm:$0xff]  ;;  %v272_v59 = vld [vmem:[#allocation2 + $0x4e0] sm:$0xff] }
  0xf2   :  { %540 = vmatprep.subr.mxu1 %v137_v60  ;;  %611 = vmatprep.subr.mxu0 %v139_v61  ;;  %v274_v60 = vld [vmem:[#allocation2 + $0x4f0] sm:$0xff]  ;;  %v265_v61 = vld [vmem:[#allocation2 + $0x4a8] sm:$0xff] }
  0xf3   :  { %541 = vmatpush1.msra.mxu1 %v136_v62  ;;  %612 = vmatpush1.msra.mxu0 %v138_v63  ;;  %v267_v62 = vld [vmem:[#allocation2 + $0x4b8] sm:$0xff]  ;;  %v264_v63 = vld [vmem:[#allocation2 + $0x4a0] sm:$0xff] }
  0xf4   :  { %542 = vmatprep.subr.mxu1 %v129_v0  ;;  %613 = vmatprep.subr.mxu0 %v131_v1  ;;  %v266_v0 = vld [vmem:[#allocation2 + $0x4b0] sm:$0xff]  ;;  %v257_v1 = vld [vmem:[#allocation2 + $0x468] sm:$0xff] }
  0xf5   :  { %543 = vmatpush1.msra.mxu1 %v128_v2  ;;  %614 = vmatpush1.msra.mxu0 %v130_v3  ;;  %v259_v2 = vld [vmem:[#allocation2 + $0x478] sm:$0xff]  ;;  %v256_v3 = vld [vmem:[#allocation2 + $0x460] sm:$0xff] }
  0xf6   :  { %544 = vmatprep.subr.mxu1 %v121_v4  ;;  %615 = vmatprep.subr.mxu0 %v123_v5  ;;  %v258_v4 = vld [vmem:[#allocation2 + $0x470] sm:$0xff]  ;;  %v249_v5 = vld [vmem:[#allocation2 + $0x428] sm:$0xff] }
  0xf7   :  { %545 = vmatpush1.msra.mxu1 %v120_v6  ;;  %616 = vmatpush1.msra.mxu0 %v122_v7  ;;  %v251_v6 = vld [vmem:[#allocation2 + $0x438] sm:$0xff]  ;;  %v248_v7 = vld [vmem:[#allocation2 + $0x420] sm:$0xff] }
  0xf8   :  { %546 = vmatprep.subr.mxu1 %v369_v9  ;;  %617 = vmatprep.subr.mxu0 %v371_v10  ;;  %v250_v9 = vld [vmem:[#allocation2 + $0x430] sm:$0xff] }
  0xf9   :  { %547 = vmatpush2.msra.mxu1 %v368_v11  ;;  %618 = vmatpush2.msra.mxu0 %v370_v12 }
  0xfa   :  { %548 = vmatprep.subr.mxu1 %v361_v13  ;;  %619 = vmatprep.subr.mxu0 %v363_v14 }
  0xfb   :  { %549 = vmatpush2.msra.mxu1 %v360_v15  ;;  %620 = vmatpush2.msra.mxu0 %v362_v16 }
  0xfc   :  { %550 = vmatprep.subr.mxu1 %v353_v17  ;;  %621 = vmatprep.subr.mxu0 %v355_v18 }
  0xfd   :  { %551 = vmatpush2.msra.mxu1 %v352_v19  ;;  %622 = vmatpush2.msra.mxu0 %v354_v20 }
  0xfe   :  { %552 = vmatprep.subr.mxu1 %v345_v21  ;;  %623 = vmatprep.subr.mxu0 %v347_v22 }
  0xff   :  { %553 = vmatpush2.msra.mxu1 %v344_v23  ;;  %624 = vmatpush2.msra.mxu0 %v346_v24 }
 0x100   :  { %554 = vmatprep.subr.mxu1 %v337_v25  ;;  %625 = vmatprep.subr.mxu0 %v339_v26 }
 0x101   :  { %555 = vmatpush2.msra.mxu1 %v336_v27  ;;  %626 = vmatpush2.msra.mxu0 %v338_v28 }
 0x102   :  { %556 = vmatprep.subr.mxu1 %v329_v29  ;;  %627 = vmatprep.subr.mxu0 %v331_v30 }
 0x103   :  { %557 = vmatpush2.msra.mxu1 %v328_v31  ;;  %628 = vmatpush2.msra.mxu0 %v330_v32 }
 0x104   :  { %558 = vmatprep.subr.mxu1 %v321_v33  ;;  %629 = vmatprep.subr.mxu0 %v323_v34 }
 0x105   :  { %559 = vmatpush2.msra.mxu1 %v320_v35  ;;  %630 = vmatpush2.msra.mxu0 %v322_v36 }
 0x106   :  { %560 = vmatprep.subr.mxu1 %v313_v37  ;;  %631 = vmatprep.subr.mxu0 %v315_v38 }
 0x107   :  { %561 = vmatpush2.msra.mxu1 %v312_v39  ;;  %632 = vmatpush2.msra.mxu0 %v314_v40 }
 0x108   :  { %562 = vmatprep.subr.mxu1 %v305_v41  ;;  %633 = vmatprep.subr.mxu0 %v307_v42 }
 0x109   :  { %563 = vmatpush2.msra.mxu1 %v304_v43  ;;  %634 = vmatpush2.msra.mxu0 %v306_v44 }
 0x10a   :  { %564 = vmatprep.subr.mxu1 %v297_v45  ;;  %635 = vmatprep.subr.mxu0 %v299_v46 }
 0x10b   :  { %565 = vmatpush2.msra.mxu1 %v296_v47  ;;  %636 = vmatpush2.msra.mxu0 %v298_v48 }
 0x10c   :  { %566 = vmatprep.subr.mxu1 %v289_v49  ;;  %637 = vmatprep.subr.mxu0 %v291_v50 }
 0x10d   :  { %567 = vmatpush2.msra.mxu1 %v288_v51  ;;  %638 = vmatpush2.msra.mxu0 %v290_v52 }
 0x10e   :  { %568 = vmatprep.subr.mxu1 %v281_v53  ;;  %639 = vmatprep.subr.mxu0 %v283_v54 }
 0x10f   :  { %569 = vmatpush2.msra.mxu1 %v280_v55  ;;  %640 = vmatpush2.msra.mxu0 %v282_v56 }
 0x110   :  { %570 = vmatprep.subr.mxu1 %v273_v57  ;;  %641 = vmatprep.subr.mxu0 %v275_v58 }
 0x111   :  { %571 = vmatpush2.msra.mxu1 %v272_v59  ;;  %642 = vmatpush2.msra.mxu0 %v274_v60 }
 0x112   :  { %572 = vmatprep.subr.mxu1 %v265_v61  ;;  %643 = vmatprep.subr.mxu0 %v267_v62 }
 0x113   :  { %573 = vmatpush2.msra.mxu1 %v264_v63  ;;  %644 = vmatpush2.msra.mxu0 %v266_v0 }
 0x114   :  { %574 = vmatprep.subr.mxu1 %v257_v1  ;;  %645 = vmatprep.subr.mxu0 %v259_v2 }
 0x115   :  { %575 = vmatpush2.msra.mxu1 %v256_v3  ;;  %646 = vmatpush2.msra.mxu0 %v258_v4 }
 0x116   :  { %576 = vmatprep.subr.mxu1 %v249_v5  ;;  %647 = vmatprep.subr.mxu0 %v251_v6 }
 0x117   :  { %577 = vmatpush2.msra.mxu1 %v248_v7  ;;  %648 = vmatpush2.msra.mxu0 %v250_v9 }
 0x118   :  { %579 = vmatmul.mubr.f32.vlgmr.msra.gmra.mxu1 %v774_v8  ;;  %650 = vmatmul.mubr.f32.vlgmr.msra.gmra.mxu0 %v774_v8 }
 0x197   :  { %v438_v10 = vpop.f32.mrf.mxu1  ;;  %v509_v11 = vpop.f32.mrf.mxu0 }
 0x198   :  { %656 = vst [vmem:[#allocation5] sm:$0xff] %v438_v10  ;;  %658 = vst [vmem:[#allocation5 + $0x10] sm:$0xff] %v509_v11 }
 0x199   :  { %v440_v12 = vpop.f32.mrf.mxu1  ;;  %v511_v13 = vpop.f32.mrf.mxu0 }
 0x19a   :  { %657 = vst [vmem:[#allocation5 + $0x8] sm:$0xff] %v440_v12  ;;  %659 = vst [vmem:[#allocation5 + $0x18] sm:$0xff] %v511_v13 }
 0x1d8   :  { %v580_v14 = vpop.f32.mrf.mxu1  ;;  %v651_v15 = vpop.f32.mrf.mxu0 }
 0x1d9   :  { %660 = vst [vmem:[#allocation5 + $0x20] sm:$0xff] %v580_v14  ;;  %662 = vst [vmem:[#allocation5 + $0x30] sm:$0xff] %v651_v15 }
 0x1da   :  { %v582_v16 = vpop.f32.mrf.mxu1  ;;  %v653_v17 = vpop.f32.mrf.mxu0 }
 0x1db   :  { %661 = vst [vmem:[#allocation5 + $0x28] sm:$0xff] %v582_v16  ;;  %663 = vst [vmem:[#allocation5 + $0x38] sm:$0xff] %v653_v17 }
 0x1dc   :  { %718 = shalt.err (!%p715_p9)
}
 0x1dd   :  { %673 = dma.vmem_to_hbm [thread:$0]  %s671_s1, 1024, %s786_s3, [#allocation4]  }
 0x1de   :  { %729 = dma.done.wait [#allocation4], 1024  }
 0x1df   :  { %730 = vsyncadd [#allocation4], 4294966272 }
 0x1e0   :  { %677 = vsyncpa [#allocation3], 1 }
 0x1e1   :  { %678 = vsyncpa [#allocation4], 1 }

</bundles_post_ra>
